<compile_context>
chip_gen: v6e
topology: v6e:2x2x1
jax: 0.10.0
libtpu: 0.0.40
codegen_flags: <defaults>
</compile_context>

<pallas_src>
import functools

import jax
import jax.numpy as jnp
from jax.experimental import pallas as pl
from jax.experimental.pallas import tpu as pltpu


LANE = 128      # vreg lane width (last dim)
SUBLANE = 8     # vreg sublane count (second-to-last dim)


def _round_up(x, m):
    return ((x + m - 1) // m) * m


# ----------------------------- fused Pallas kernel ------------------------------


def _fused_forward_kernel(*args, order_list):
    """Entire GraphScale forward in one kernel invocation.

    Ref order:
        x,
        for each layer i: w_i, b_i, (adj_i if order_list[i] == 1),
        w_out, b_out,
        o_ref
    Activations stay resident (no HBM round trip between layers).
    """
    o_ref = args[-1]
    refs = args[:-1]

    idx = 0
    act = refs[idx][...]                 # bf16 [Np, F0p]
    idx += 1

    for order in order_list:
        w = refs[idx][...]               # bf16 [Dinp, Hp]
        b = refs[idx + 1][...]           # f32  [1, Hp]
        idx += 2
        # nn.Linear part: h = act @ W + b   (f32 MXU accumulation)
        h = jnp.dot(act, w, preferred_element_type=jnp.float32) + b
        if order == 1:
            # GraphSageConvolution (use_lynorm=False): concat([h, adj @ h], axis=1)
            adj = refs[idx][...]         # bf16 [Np, Np]
            idx += 1
            agg = jnp.dot(adj, h.astype(jnp.bfloat16),
                          preferred_element_type=jnp.float32)
            h = jnp.concatenate([h, agg], axis=1)   # lane-dense concat in registers
        # ReLU (dropout = identity in eval mode); keep activations bf16 for the MXU.
        act = jnp.maximum(h, 0.0).astype(jnp.bfloat16)

    # gc_out: plain linear, no activation
    w_out = refs[idx][...]
    b_out = refs[idx + 1][...]
    out = jnp.dot(act, w_out, preferred_element_type=jnp.float32) + b_out
    o_ref[...] = out.astype(o_ref.dtype)            # single lane-dense store


# ------------------------------ host-side padding -------------------------------


def _pad2d(a, rows_p, cols_p, dtype):
    out = jnp.zeros((rows_p, cols_p), dtype)
    return out.at[: a.shape[0], : a.shape[1]].set(a.astype(dtype))


def _pad_weight(w, in_layout, d_out_p, dtype):
    """Pad a [d_in, d_out] weight so its input rows line up with the padded
    activation layout. in_layout: list of (real, padded) input-feature segments."""
    total_p = sum(p for _, p in in_layout)
    wp = jnp.zeros((total_p, d_out_p), dtype)
    r = 0
    rp = 0
    for real, padded in in_layout:
        wp = wp.at[rp : rp + real, : w.shape[1]].set(w[r : r + real].astype(dtype))
        r += real
        rp += padded
    return wp


def _build_operands(x, adjs, params, out_params, order_list):
    n, nfeat = x.shape
    nhid = params[0][0].shape[1]
    w_out, b_out = out_params
    num_classes = w_out.shape[1]

    np_ = _round_up(n, SUBLANE)
    f0p = _round_up(nfeat, LANE)
    hp = _round_up(nhid, LANE)
    cp = _round_up(num_classes, LANE)

    args = [_pad2d(x, np_, f0p, jnp.bfloat16)]
    in_layout = [(nfeat, f0p)]
    flops = 0
    din_p = f0p
    for i, order in enumerate(order_list):
        w, b = params[i]
        args.append(_pad_weight(w, in_layout, hp, jnp.bfloat16))
        args.append(_pad2d(b, 1, hp, jnp.float32))
        flops += 2 * np_ * din_p * hp
        if order == 1:
            args.append(_pad2d(adjs[i], np_, np_, jnp.bfloat16))
            flops += 2 * np_ * np_ * hp
            in_layout = [(nhid, hp), (nhid, hp)]
            din_p = 2 * hp
        else:
            in_layout = [(nhid, hp)]
            din_p = hp

    args.append(_pad_weight(w_out, in_layout, cp, jnp.bfloat16))
    args.append(_pad2d(b_out, 1, cp, jnp.float32))
    flops += 2 * np_ * din_p * cp

    bytes_accessed = sum(int(a.size) * a.dtype.itemsize for a in args) + np_ * cp * 4
    meta = dict(n=n, num_classes=num_classes, np_=np_, cp=cp,
                flops=int(flops), bytes_accessed=int(bytes_accessed))
    return args, meta


# ------------------------------ model wrapper ------------------------------


def set_dims(nfeat, nhid, order_list):
    dims = []
    for i, _ in enumerate(order_list):
        if i == 0:
            dims.append((nfeat, nhid))
        elif order_list[i - 1] == 1:
            dims.append((2 * nhid, nhid))
        else:
            dims.append((nhid, nhid))
    return dims


def init_params(key, nfeat, nhid, num_classes, order_list):
    """Deterministic init mimicking torch.nn.Linear default (uniform +/- 1/sqrt(fan_in))."""
    dims = set_dims(nfeat, nhid, order_list)
    params = []
    for (d_in, d_out) in dims:
        key, kw, kb = jax.random.split(key, 3)
        bound = 1.0 / jnp.sqrt(d_in)
        w = jax.random.uniform(kw, (d_in, d_out), jnp.float32, -bound, bound)
        b = jax.random.uniform(kb, (1, d_out), jnp.float32, -bound, bound)
        params.append((w, b))
    d_in_out = 2 * nhid if order_list[-1] == 1 else nhid
    key, kw, kb = jax.random.split(key, 3)
    bound = 1.0 / jnp.sqrt(d_in_out)
    w_out = jax.random.uniform(kw, (d_in_out, num_classes), jnp.float32, -bound, bound)
    b_out = jax.random.uniform(kb, (1, num_classes), jnp.float32, -bound, bound)
    return params, (w_out, b_out)


def graphscale_forward(x, adjs, params, out_params, order_list):
    args, meta = _build_operands(x, adjs, params, out_params, order_list)
    np_, cp = meta["np_"], meta["cp"]
    kernel = functools.partial(_fused_forward_kernel, order_list=tuple(order_list))
    out_p = pl.pallas_call(
        kernel,
        out_shape=jax.ShapeDtypeStruct((np_, cp), jnp.float32),
        in_specs=[pl.BlockSpec(a.shape, lambda: (0, 0)) for a in args],
        out_specs=pl.BlockSpec((np_, cp), lambda: (0, 0)),
        compiler_params=pltpu.CompilerParams(vmem_limit_bytes=32 * 1024 * 1024),
        cost_estimate=pl.CostEstimate(flops=meta["flops"], transcendentals=0,
                                      bytes_accessed=meta["bytes_accessed"]),
    )(*args)
    return out_p[: meta["n"], : meta["num_classes"]]


def _reference_forward(args, order_list):
    """Pure-JAX replay of the exact padded/bf16 math, for validation."""
    idx = 0
    act = args[idx]
    idx += 1
    for order in order_list:
        w = args[idx]
        b = args[idx + 1]
        idx += 2
        h = jnp.dot(act, w, preferred_element_type=jnp.float32) + b
        if order == 1:
            adj = args[idx]
            idx += 1
            agg = jnp.dot(adj, h.astype(jnp.bfloat16),
                          preferred_element_type=jnp.float32)
            h = jnp.concatenate([h, agg], axis=1)
        act = jnp.maximum(h, 0.0).astype(jnp.bfloat16)
    w_out = args[idx]
    b_out = args[idx + 1]
    return jnp.dot(act, w_out, preferred_element_type=jnp.float32) + b_out


# ---------------------------------- main -----------------------------------


if __name__ == "__main__":
    # Small, forward-consistent shapes
    N = 16            # number of nodes in the mini-batch
    NFEAT = 32
    NHID = 32
    NUM_CLASSES = 8
    ORDER_LIST = [0, 1]   # layer 0: nn.Linear, layer 1: GraphSageConvolution

    key = jax.random.PRNGKey(0)
    key, kx, kadj = jax.random.split(key, 3)

    x = jax.random.normal(kx, (N, NFEAT), jnp.float32)

    # One dense adjacency per layer (row-normalized), as torch.spmm(adj, h) would use.
    adjs = []
    for i in range(len(ORDER_LIST)):
        kadj, ka = jax.random.split(kadj)
        a = (jax.random.uniform(ka, (N, N)) < 0.3).astype(jnp.float32)
        a = a + jnp.eye(N, dtype=jnp.float32)          # self loops
        a = a / jnp.sum(a, axis=1, keepdims=True)      # row-normalize
        adjs.append(a)

    params, out_params = init_params(key, NFEAT, NHID, NUM_CLASSES, ORDER_LIST)

    out = graphscale_forward(x, adjs, params, out_params, ORDER_LIST)
    out = jax.block_until_ready(out)

    assert out.shape == (N, NUM_CLASSES), out.shape
    assert bool(jnp.all(jnp.isfinite(out)))

    # Validate against a pure-JAX replay of the same padded/bf16 computation.
    ref_args, _ = _build_operands(x, adjs, params, out_params, ORDER_LIST)
    ref = _reference_forward(ref_args, ORDER_LIST)[:N, :NUM_CLASSES]
    assert jnp.allclose(out, ref, atol=1e-2, rtol=1e-2), \
        float(jnp.max(jnp.abs(out - ref)))

    print("KERNEL_OK")
</pallas_src>

<mosaic_0001>
module attributes {stable_mosaic.version = 11 : i64} {
  func.func @_fused_forward_kernel(%arg0: memref<16x128xbf16, #tpu.memory_space<vmem>>, %arg1: memref<128x128xbf16, #tpu.memory_space<vmem>>, %arg2: memref<1x128xf32, #tpu.memory_space<vmem>>, %arg3: memref<128x128xbf16, #tpu.memory_space<vmem>>, %arg4: memref<1x128xf32, #tpu.memory_space<vmem>>, %arg5: memref<16x16xbf16, #tpu.memory_space<vmem>>, %arg6: memref<256x128xbf16, #tpu.memory_space<vmem>>, %arg7: memref<1x128xf32, #tpu.memory_space<vmem>>, %arg8: memref<16x128xf32, #tpu.memory_space<vmem>>) attributes {dimension_semantics = [], scalar_prefetch = 0 : i64, scratch_operands = 0 : i64, tpu.core_type = #tpu.core_type<tc>} {
    %c0 = arith.constant 0 : index
    %c0_0 = arith.constant 0 : index
    %0 = vector.load %arg0[%c0, %c0_0] : memref<16x128xbf16, #tpu.memory_space<vmem>>, vector<16x128xbf16>
    %c0_1 = arith.constant 0 : index
    %c0_2 = arith.constant 0 : index
    %1 = vector.load %arg1[%c0_1, %c0_2] : memref<128x128xbf16, #tpu.memory_space<vmem>>, vector<128x128xbf16>
    %c0_3 = arith.constant 0 : index
    %c0_4 = arith.constant 0 : index
    %2 = vector.load %arg2[%c0_3, %c0_4] : memref<1x128xf32, #tpu.memory_space<vmem>>, vector<1x128xf32>
    %cst = arith.constant dense<0.000000e+00> : vector<16x128xf32>
    %3 = tpu.matmul %0, %1, %cst {dimension_numbers = #tpu.dot_dimension_numbers<[1], [0], [0], [1], [0, 0, 1, 1], [], []>} : vector<16x128xbf16>, vector<128x128xbf16>, vector<16x128xf32> -> vector<16x128xf32>
    %4 = vector.broadcast %2 : vector<1x128xf32> to vector<16x128xf32>
    %5 = arith.addf %3, %4 : vector<16x128xf32>
    %cst_5 = arith.constant 0.000000e+00 : f32
    %6 = vector.broadcast %cst_5 : f32 to vector<16x128xf32>
    %7 = arith.maximumf %5, %6 : vector<16x128xf32>
    %8 = arith.truncf %7 : vector<16x128xf32> to vector<16x128xbf16>
    %c0_6 = arith.constant 0 : index
    %c0_7 = arith.constant 0 : index
    %9 = vector.load %arg3[%c0_6, %c0_7] : memref<128x128xbf16, #tpu.memory_space<vmem>>, vector<128x128xbf16>
    %c0_8 = arith.constant 0 : index
    %c0_9 = arith.constant 0 : index
    %10 = vector.load %arg4[%c0_8, %c0_9] : memref<1x128xf32, #tpu.memory_space<vmem>>, vector<1x128xf32>
    %cst_10 = arith.constant dense<0.000000e+00> : vector<16x128xf32>
    %11 = tpu.matmul %8, %9, %cst_10 {dimension_numbers = #tpu.dot_dimension_numbers<[1], [0], [0], [1], [0, 0, 1, 1], [], []>} : vector<16x128xbf16>, vector<128x128xbf16>, vector<16x128xf32> -> vector<16x128xf32>
    %12 = vector.broadcast %10 : vector<1x128xf32> to vector<16x128xf32>
    %13 = arith.addf %11, %12 : vector<16x128xf32>
    %c0_11 = arith.constant 0 : index
    %c0_12 = arith.constant 0 : index
    %14 = vector.load %arg5[%c0_11, %c0_12] : memref<16x16xbf16, #tpu.memory_space<vmem>>, vector<16x16xbf16>
    %15 = arith.truncf %13 : vector<16x128xf32> to vector<16x128xbf16>
    %cst_13 = arith.constant dense<0.000000e+00> : vector<16x128xf32>
    %16 = tpu.matmul %14, %15, %cst_13 {dimension_numbers = #tpu.dot_dimension_numbers<[1], [0], [0], [1], [0, 0, 1, 1], [], []>} : vector<16x16xbf16>, vector<16x128xbf16>, vector<16x128xf32> -> vector<16x128xf32>
    %17 = tpu.concatenate %13, %16 in 1 : vector<16x128xf32>, vector<16x128xf32> -> vector<16x256xf32>
    %cst_14 = arith.constant 0.000000e+00 : f32
    %18 = vector.broadcast %cst_14 : f32 to vector<16x256xf32>
    %19 = arith.maximumf %17, %18 : vector<16x256xf32>
    %20 = arith.truncf %19 : vector<16x256xf32> to vector<16x256xbf16>
    %c0_15 = arith.constant 0 : index
    %c0_16 = arith.constant 0 : index
    %21 = vector.load %arg6[%c0_15, %c0_16] : memref<256x128xbf16, #tpu.memory_space<vmem>>, vector<256x128xbf16>
    %c0_17 = arith.constant 0 : index
    %c0_18 = arith.constant 0 : index
    %22 = vector.load %arg7[%c0_17, %c0_18] : memref<1x128xf32, #tpu.memory_space<vmem>>, vector<1x128xf32>
    %cst_19 = arith.constant dense<0.000000e+00> : vector<16x128xf32>
    %23 = tpu.matmul %20, %21, %cst_19 {dimension_numbers = #tpu.dot_dimension_numbers<[1], [0], [0], [1], [0, 0, 1, 1], [], []>} : vector<16x256xbf16>, vector<256x128xbf16>, vector<16x128xf32> -> vector<16x128xf32>
    %24 = vector.broadcast %22 : vector<1x128xf32> to vector<16x128xf32>
    %25 = arith.addf %23, %24 : vector<16x128xf32>
    %c0_20 = arith.constant 0 : index
    %c0_21 = arith.constant 0 : index
    %26 = vector.load %arg8[%c0_20, %c0_21] : memref<16x128xf32, #tpu.memory_space<vmem>>, vector<16x128xf32>
    tpu.vector_store %arg8[%c0_20, %c0_21], %25 {strides = array<i32>} : memref<16x128xf32, #tpu.memory_space<vmem>>, vector<16x128xf32>,
    return
  }
}

</mosaic_0001>

<bundles_post_ra>
// kernel: tpu_custom_call.1
= control target key start
LH: loop header
LB: loop body
LE: loop exit
PB: predicated region body
PF: predicated region fallthrough
CT: control target
= control target key end

     0   :  { %13 = vsyncpa [#allocation3], 0  ;;  %s987_s0 = inlined_call_operand.hbm [shape: bf16[16,128], index: 0, kind: input, shape index: {}]   ;;  %s988_s1 = inlined_call_operand.hbm [shape: bf16[128,128], index: 1, kind: input, shape index: {}]   ;;  %s989_s2 = inlined_call_operand.vmem [shape: f32[1,128], index: 2, kind: input, shape index: {}]   ;;  %s990_s3 = inlined_call_operand.hbm [shape: bf16[128,128], index: 3, kind: input, shape index: {}]   ;;  %s991_s4 = inlined_call_operand.hbm [shape: f32[1,128], index: 4, kind: input, shape index: {}]   ;;  %s992_s5 = inlined_call_operand.vmem [shape: bf16[16,16], index: 5, kind: input, shape index: {}]   ;;  %s993_s6 = inlined_call_operand.hbm [shape: bf16[256,128], index: 6, kind: input, shape index: {}]   ;;  %s994_s7 = inlined_call_operand.vmem [shape: f32[1,128], index: 7, kind: input, shape index: {}]   ;;  %s995_s8 = inlined_call_operand.hbm [shape: f32[16,128], index: 8, kind: output, shape index: {}]  }
   0x1   :  { %14 = vsyncpa [#allocation6], 0 }
   0x2   :  { %15 = vsyncpa [#allocation9], 0 }
   0x3   :  { %16 = vsyncpa [#allocation4], 0  ;;  %s888_s27 = smov [#allocation5]   ;;  %s889_s29 = smov [#allocation8]  }
   0x4   :  { %s34_s28 = sshll.u32 %s888_s27, 4  ;;  %s61_s30 = sshll.u32 %s889_s29, 4  ;;  %s35_s28 = int_to_ptr.vmem [resolvable:$true] %s34_s28  ;;  %s62_s30 = int_to_ptr.vmem [resolvable:$true] %s61_s30 }
   0x5   :  { %s768_s9 = scalar_lea.vmem %s35_s28, 1024  ;;  %p773_p1 = scmp.lt.s32.totalorder %s35_s28, %s35_s28 }
   0x6   :  { %p769_p0 = scmp.ne.s32.totalorder %s35_s28, %s768_s9  ;;  %p774_p2 = scmp.lt.s32.totalorder %s768_s9, %s768_s9 }
   0x8   :  { %p775_p3 = por %p774_p2, %p773_p1 }
   0xa   :  { %p776_p4 = pnand %p775_p3, %p769_p0 }
   0xc   :  { %779 = shalt.err (!%p776_p4)
}
   0xd   :  { %s890_s10 = smov 64   ;;  %s891_s11 = smov 4  }
   0xe   :  { %40 = dma.hbm_to_vmem [thread:$0]  %s988_s1, 1024, %s35_s28, [#allocation6], %s890_s10, %s890_s10, %s891_s11  }
   0xf   :  { %s788_s14 = scalar_lea.vmem %s62_s30, 16  ;;  %s792_s15 = scalar_lea.vmem %s62_s30, 32 }
  0x10   :  { %p789_p5 = scmp.ne.s32.totalorder %s62_s30, %s788_s14  ;;  %p793_p6 = scmp.lt.s32.totalorder %s62_s30, %s62_s30 }
  0x11   :  { %p794_p7 = scmp.lt.s32.totalorder %s792_s15, %s788_s14 }
  0x13   :  { %p795_p8 = por %p794_p7, %p793_p6 }
  0x15   :  { %p796_p9 = pnand %p795_p8, %p789_p5 }
  0x17   :  { %799 = shalt.err (!%p796_p9)
}
  0x18   :  { %64 = dma.hbm_to_vmem [thread:$0]  %s991_s4, 16, %s62_s30, [#allocation9]  }
  0x19   :  { %s892_s18 = smov [#allocation2]   ;;  %s893_s20 = smov [#allocation7]  }
  0x1a   :  { %s22_s19 = sshll.u32 %s892_s18, 4  ;;  %s48_s21 = sshll.u32 %s893_s20, 4  ;;  %s23_s19 = int_to_ptr.vmem [resolvable:$true] %s22_s19  ;;  %s49_s21 = int_to_ptr.vmem [resolvable:$true] %s48_s21 }
  0x1b   :  { %s808_s22 = scalar_lea.vmem %s23_s19, 128  ;;  %p813_p11 = scmp.lt.s32.totalorder %s23_s19, %s23_s19 }
  0x1c   :  { %p809_p10 = scmp.ne.s32.totalorder %s23_s19, %s808_s22  ;;  %p814_p12 = scmp.lt.s32.totalorder %s808_s22, %s808_s22 }
  0x1e   :  { %p815_p13 = por %p814_p12, %p813_p11 }
  0x20   :  { %p816_p0 = pnand %p815_p13, %p809_p10 }
  0x22   :  { %819 = shalt.err (!%p816_p0)
}
  0x23   :  { %28 = dma.hbm_to_vmem [thread:$0]  %s987_s0, 128, %s23_s19, [#allocation3], %s890_s10, %s890_s10, %s891_s11  }
  0x24   :  { %s828_s4 = scalar_lea.vmem %s49_s21, 1024  ;;  %p833_p2 = scmp.lt.s32.totalorder %s49_s21, %s49_s21 }
  0x25   :  { %p829_p1 = scmp.ne.s32.totalorder %s49_s21, %s828_s4  ;;  %p834_p3 = scmp.lt.s32.totalorder %s828_s4, %s828_s4 }
  0x27   :  { %p835_p4 = por %p834_p3, %p833_p2 }
  0x29   :  { %p836_p5 = pnand %p835_p4, %p829_p1 }
  0x2b   :  { %839 = shalt.err (!%p836_p5)
}
  0x2c   :  { %54 = dma.hbm_to_vmem [thread:$0]  %s990_s3, 1024, %s49_s21, [#allocation6], %s890_s10, %s890_s10, %s891_s11  }
  0x2d   :  { %s894_s26 = smov [#allocation10]  }
  0x2e   :  { %s72_s27 = sshll.u32 %s894_s26, 4  ;;  %s73_s27 = int_to_ptr.vmem [resolvable:$true] %s72_s27 }
  0x2f   :  { %s848_s28 = scalar_lea.vmem %s73_s27, 2048  ;;  %p853_p7 = scmp.lt.s32.totalorder %s73_s27, %s73_s27 }
  0x30   :  { %p849_p6 = scmp.ne.s32.totalorder %s73_s27, %s848_s28  ;;  %p854_p8 = scmp.lt.s32.totalorder %s848_s28, %s848_s28 }
  0x32   :  { %p855_p9 = por %p854_p8, %p853_p7 }
  0x34   :  { %p856_p10 = pnand %p855_p9, %p849_p6 }
  0x36   :  { %859 = shalt.err (!%p856_p10)
}
  0x37   :  { %78 = dma.hbm_to_vmem [thread:$0]  %s993_s6, 2048, %s73_s27, [#allocation9], %s890_s10, %s890_s10, %s891_s11  }
  0x38   :  { %880 = dma.done.wait [#allocation3], 128  }
  0x39   :  { %881 = vsyncadd [#allocation3], 4294967168 }
  0x3a   :  { %882 = dma.done.wait [#allocation6], 2048  }
  0x3b   :  { %883 = vsyncadd [#allocation6], 4294965248 }
  0x3c   :  { %884 = dma.done.wait [#allocation9], 2064  }
  0x3d   :  { %885 = vsyncadd [#allocation9], 4294965232  ;;  %v895_v0 = vmov 0.0   ;;  %vm896_vm0 = vmmov 0   ;;  %v726_v1 = vld [vmem:[#allocation5 + $0x38] sm:$0xff]   ;;  %v727_v2 = vld [vmem:[#allocation5 + $0x30] sm:$0xff]  }
  0x3e   :  { %668 = vmatprep.subr.bf16.mxu0 %v895_v0  ;;  %684 = vmatprep.mubr.msk.bf16.mxu0 %vm896_vm0, %v895_v0  ;;  %v728_v3 = vld [vmem:[#allocation5 + $0x28] sm:$0xff]   ;;  %v735_v4 = vld [vmem:[#allocation7 + $0x38] sm:$0xff]   ;;  %v729_v5 = vld [vmem:[#allocation5 + $0x20] sm:$0xff]   ;;  %vm340_vm1 = vcmask 130048   ;;  %s897_s10 = smov [#allocation11]  }
  0x3f   :  { %688 = vmatprep.subr.bf16.mxu1 %v895_v0  ;;  %704 = vmatprep.mubr.msk.bf16.mxu1 %vm896_vm0, %v895_v0  ;;  %v736_v6 = vld [vmem:[#allocation7 + $0x30] sm:$0xff]   ;;  %v730_v7 = vld [vmem:[#allocation5 + $0x18] sm:$0xff]   ;;  %v737_v8 = vld [vmem:[#allocation7 + $0x28] sm:$0xff]   ;;  %s574_s11 = sshll.u32 %s897_s10, 4  ;;  %s575_s11 = int_to_ptr.vmem [resolvable:$true] %s574_s11 }
  0x40   :  { %669 = vmatpush3.bf16.msra.mxu0 %v726_v1  ;;  %689 = vmatpush3.bf16.msra.mxu1 %v735_v4  ;;  %v731_v9 = vld [vmem:[#allocation5 + $0x10] sm:$0xff]   ;;  %v738_v10 = vld [vmem:[#allocation7 + $0x20] sm:$0xff]   ;;  %v732_v11 = vld [vmem:[#allocation5 + $0x8] sm:$0xff]   ;;  %s860_s12 = scalar_lea.vmem %s575_s11, 256  ;;  %p865_p12 = scmp.lt.s32.totalorder %s575_s11, %s575_s11 }
  0x41   :  { %670 = vmatprep.subr.bf16.mxu0 %v895_v0  ;;  %690 = vmatprep.subr.bf16.mxu1 %v895_v0  ;;  %v739_v12 = vld [vmem:[#allocation7 + $0x18] sm:$0xff]   ;;  %v733_v13 = vld [vmem:[#allocation5] sm:$0xff]   ;;  %v740_v15 = vld [vmem:[#allocation7 + $0x10] sm:$0xff]   ;;  %p861_p11 = scmp.ne.s32.totalorder %s575_s11, %s860_s12  ;;  %p866_p13 = scmp.lt.s32.totalorder %s860_s12, %s860_s12 }
  0x42   :  { %v734_v14 = vld [vmem:[#allocation2] sm:$0xff]   ;;  %v741_v16 = vld [vmem:[#allocation7 + $0x8] sm:$0xff]   ;;  %v742_v17 = vld [vmem:[#allocation7] sm:$0xff]  }
  0x43   :  { %v588_v18 = vld [vmem:[%s989_s2] ss:$0 sm:$0xff]  ;;  %v744_v28 = vld [vmem:[#allocation10 + $0x78] sm:$0xff]   ;;  %v748_v32 = vld [vmem:[#allocation10 + $0x68] sm:$0xff]   ;;  %p867_p0 = por %p866_p13, %p865_p12 }
  0x44   :  { %671 = vmatpush3.bf16.msra.mxu0 %v727_v2  ;;  %691 = vmatpush3.bf16.msra.mxu1 %v736_v6  ;;  %v745_v29 = vld [vmem:[#allocation10 + $0x38] sm:$0xff]   ;;  %v746_v30 = vld [vmem:[#allocation10 + $0x70] sm:$0xff]   ;;  %v749_v33 = vld [vmem:[#allocation10 + $0x28] sm:$0xff]  }
  0x45   :  { %672 = vmatprep.subr.bf16.mxu0 %v895_v0  ;;  %692 = vmatprep.subr.bf16.mxu1 %v895_v0  ;;  %v747_v31 = vld [vmem:[#allocation10 + $0x30] sm:$0xff]   ;;  %v750_v34 = vld [vmem:[#allocation10 + $0x60] sm:$0xff]   ;;  %v752_v36 = vld [vmem:[#allocation10 + $0x58] sm:$0xff]   ;;  %p868_p1 = pnand %p867_p0, %p861_p11 }
  0x46   :  { %v751_v35 = vld [vmem:[#allocation10 + $0x20] sm:$0xff]   ;;  %v753_v37 = vld [vmem:[#allocation10 + $0x18] sm:$0xff]   ;;  %v754_v38 = vld [vmem:[#allocation10 + $0x50] sm:$0xff]  }
  0x47   :  { %v755_v39 = vld [vmem:[#allocation10 + $0x10] sm:$0xff]   ;;  %v598_v40 = vld [vmem:[#allocation8] ss:$0 sm:$0xff]  ;;  %v756_v52 = vld [vmem:[#allocation10 + $0x48] sm:$0xff]  }
  0x48   :  { %673 = vmatpush3.bf16.msra.mxu0 %v728_v3  ;;  %693 = vmatpush3.bf16.msra.mxu1 %v737_v8  ;;  %v743_v50 = vld [vmem:[%s992_s5] sm:$0xff]   ;;  %v757_v53 = vld [vmem:[#allocation10 + $0x8] sm:$0xff]   ;;  %v758_v54 = vld [vmem:[#allocation10 + $0x40] sm:$0xff]  }
  0x49   :  { %674 = vmatprep.subr.bf16.mxu0 %v895_v0  ;;  %694 = vmatprep.subr.bf16.mxu1 %v895_v0  ;;  %v759_v55 = vld [vmem:[#allocation10] sm:$0xff]  }
  0x4c   :  { %675 = vmatpush3.bf16.msra.mxu0 %v729_v5  ;;  %695 = vmatpush3.bf16.msra.mxu1 %v738_v10 }
  0x4d   :  { %676 = vmatprep.subr.bf16.mxu0 %v895_v0  ;;  %696 = vmatprep.subr.bf16.mxu1 %v895_v0 }
  0x50   :  { %677 = vmatpush3.bf16.msra.mxu0 %v730_v7  ;;  %697 = vmatpush3.bf16.msra.mxu1 %v739_v12 }
  0x51   :  { %678 = vmatprep.subr.bf16.mxu0 %v895_v0  ;;  %698 = vmatprep.subr.bf16.mxu1 %v895_v0 }
  0x54   :  { %679 = vmatpush3.bf16.msra.mxu0 %v731_v9  ;;  %699 = vmatpush3.bf16.msra.mxu1 %v740_v15 }
  0x55   :  { %680 = vmatprep.subr.bf16.mxu0 %v895_v0  ;;  %700 = vmatprep.subr.bf16.mxu1 %v895_v0 }
  0x58   :  { %681 = vmatpush3.bf16.msra.mxu0 %v732_v11  ;;  %701 = vmatpush3.bf16.msra.mxu1 %v741_v16 }
  0x59   :  { %682 = vmatprep.subr.bf16.mxu0 %v895_v0  ;;  %702 = vmatprep.subr.bf16.mxu1 %v895_v0 }
  0x5c   :  { %683 = vmatpush3.bf16.msra.mxu0 %v733_v13  ;;  %703 = vmatpush3.bf16.msra.mxu1 %v742_v17 }
  0x5d   :  { %708 = vmatprep.subr.bf16.mxu0 %v895_v0  ;;  %646 = vmatprep.subr.bf16.mxu1 %v744_v28 }
  0x5f   :  { %685 = vmatmul.mubr.bf16.vlgmr.msra.gmra.mxu0 %v734_v14 }
  0x60   :  { %710 = vmatprep.mubr.msk.bf16.mxu0 %vm896_vm0, %v895_v0  ;;  %v609_v0 = vld [vmem:[%s994_s7] ss:$0 sm:$0xff] }
 0x11f   :  { %v210_v19 = vpop.f32.mrf.mxu0 }
 0x120   :  { %v211_v21 = vadd.f32 %v588_v18, %v210_v19 }
 0x121   :  { %v686_v20 = vpop.f32.mrf.mxu0 }
 0x122   :  { %v217_v25 = vmax.f32 %v211_v21, 0.0 }
 0x123   :  { %v213_v22 = vpop.f32.mrf.mxu0 }
 0x124   :  { %v214_v23 = vadd.f32 %v588_v18, %v213_v22 }
 0x125   :  { %v687_v24 = vpop.f32.mrf.mxu0 }
 0x126   :  { %v218_v26 = vmax.f32 %v214_v23, 0.0 }
 0x128   :  { %v219_v27 = vpack.c.bf16 %v218_v26, %v217_v25 }
 0x12a   :  { %705 = vmatmul.mubr.bf16.vlgmr.msra.gmra.mxu1 %v219_v27 }
 0x12b   :  { %647 = vmatpush3.bf16.msra.mxu1 %v745_v29 }
 0x12c   :  { %648 = vmatprep.subr.bf16.mxu1 %v746_v30 }
 0x12f   :  { %649 = vmatpush3.bf16.msra.mxu1 %v747_v31 }
 0x130   :  { %650 = vmatprep.subr.bf16.mxu1 %v748_v32 }
 0x133   :  { %651 = vmatpush3.bf16.msra.mxu1 %v749_v33 }
 0x134   :  { %652 = vmatprep.subr.bf16.mxu1 %v750_v34 }
 0x137   :  { %653 = vmatpush3.bf16.msra.mxu1 %v751_v35 }
 0x138   :  { %654 = vmatprep.subr.bf16.mxu1 %v752_v36 }
 0x13b   :  { %655 = vmatpush3.bf16.msra.mxu1 %v753_v37 }
 0x13c   :  { %656 = vmatprep.subr.bf16.mxu1 %v754_v38 }
 0x13f   :  { %657 = vmatpush3.bf16.msra.mxu1 %v755_v39 }
 0x140   :  { %658 = vmatprep.subr.bf16.mxu1 %v756_v52 }
 0x143   :  { %659 = vmatpush3.bf16.msra.mxu1 %v757_v53 }
 0x144   :  { %660 = vmatprep.subr.bf16.mxu1 %v758_v54 }
 0x147   :  { %661 = vmatpush3.bf16.msra.mxu1 %v759_v55 }
 0x1ea   :  { %v325_v41 = vpop.f32.mrf.mxu1 }
 0x1eb   :  { %v326_v43 = vadd.f32 %v598_v40, %v325_v41 }
 0x1ec   :  { %v706_v42 = vpop.f32.mrf.mxu1 }
 0x1ed   :  { %v385_v47 = vmax.f32 %v326_v43, 0.0 }
 0x1ee   :  { %v328_v44 = vpop.f32.mrf.mxu1 }
 0x1ef   :  { %v329_v45 = vadd.f32 %v598_v40, %v328_v44 }
 0x1f0   :  { %v707_v46 = vpop.f32.mrf.mxu1 }
 0x1f1   :  { %v334_v48 = vpack.c.bf16 %v329_v45, %v326_v43  ;;  %v387_v49 = vmax.f32 %v329_v45, 0.0 }
 0x1f3   :  { %v389_v51 = vpack.c.bf16 %v387_v49, %v385_v47  ;;  %709 = vmatpush3.bf16.msra.mxu0 %v334_v48 }
 0x1f6   :  { %711 = vmatmul.mubr.msk.bf16.vlgmr.msra.gmra.mxu0 %vm340_vm1, %v743_v50 }
 0x2b6   :  { %v378_v56 = vpop.f32.mrf.mxu0 }
 0x2b7   :  { %v386_v59 = vmax.f32 %v378_v56, 0.0 }
 0x2b8   :  { %v712_v57 = vpop.f32.mrf.mxu0 }
 0x2ba   :  { %v381_v58 = vpop.f32.mrf.mxu0 }
 0x2bb   :  { %v388_v60 = vmax.f32 %v381_v58, 0.0 }
 0x2bc   :  { %v713_v61 = vpop.f32.mrf.mxu0 }
 0x2bd   :  { %v390_v62 = vpack.c.bf16 %v388_v60, %v386_v59 }
 0x2bf   :  { %558 = vmatprep.mubr.bf16.mxu1 %v390_v62 }
 0x2c0   :  { %559 = vmatmul.mubr.bf16.vlgmr.msra.gmra.mxu1 %v389_v51 }
 0x380   :  { %v662_v63 = vpop.f32.mrf.mxu1 }
 0x382   :  { %v663_v1 = vpop.f32.mrf.mxu1 }
 0x383   :  { %v664_v2 = vadd.f32 %v663_v1, %v662_v63 }
 0x384   :  { %v665_v3 = vpop.f32.mrf.mxu1 }
 0x385   :  { %v561_v4 = vadd.f32 %v664_v2, %v609_v0 }
 0x386   :  { %v666_v5 = vpop.f32.mrf.mxu1 }
 0x387   :  { %567 = vst [vmem:[#allocation11] sm:$0xff] %v561_v4  ;;  %v667_v6 = vadd.f32 %v666_v5, %v665_v3 }
 0x389   :  { %v564_v7 = vadd.f32 %v667_v6, %v609_v0 }
 0x38b   :  { %568 = vst [vmem:[#allocation11 + $0x8] sm:$0xff] %v564_v7 }
 0x38c   :  { %871 = shalt.err (!%p868_p1)
}
 0x38d   :  { %s898_s7 = smov 128   ;;  %s899_s13 = smov 8  }
 0x38e   :  { %580 = dma.vmem_to_hbm [thread:$0]  %s575_s11, 256, %s995_s8, [#allocation4], %s898_s7, %s898_s7, %s899_s13  }
 0x38f   :  { %886 = dma.done.wait [#allocation4], 256  }
 0x390   :  { %887 = vsyncadd [#allocation4], 4294967040 }
 0x391   :  { %584 = vsyncpa [#allocation3], 1 }
 0x392   :  { %585 = vsyncpa [#allocation6], 1 }
 0x393   :  { %586 = vsyncpa [#allocation9], 1 }
 0x394   :  { %587 = vsyncpa [#allocation4], 1 }

</bundles_post_ra>
